<compile_context>
chip_gen: v7x
topology: tpu7x:2x2x1
jax: 0.10.0
libtpu: 0.0.40
codegen_flags: <defaults>
</compile_context>

<pallas_src>
import jax
import jax.numpy as jnp
from jax.experimental import pallas as pl
from jax.experimental.pallas import tpu as pltpu


def mlp_kernel(x_ref, w1_ref, b1_ref, w2_ref, b2_ref, o_ref):
    # Layer 1: (TB, D_in)bf16 @ (D_in, H)bf16 -> f32 acc on the MXU.
    h = jnp.dot(x_ref[...], w1_ref[...], preferred_element_type=jnp.float32)
    h = jnp.maximum(h + b1_ref[...], 0.0)          # bias + ReLU in f32 (VPU)
    # Layer 2: downcast activations to bf16 for the MXU, accumulate in f32.
    out = jnp.dot(h.astype(jnp.bfloat16), w2_ref[...],
                  preferred_element_type=jnp.float32)
    o_ref[...] = (out + b2_ref[...]).astype(o_ref.dtype)


def _round_up(x, m):
    return ((x + m - 1) // m) * m


def _choose_tile_b(B):
    """Pick an MXU-friendly M tile; keep >=2 grid steps when possible (v7x)."""
    if B >= 1024:
        return 512                      # big tile, still tiny vs. VMEM
    if B >= 512:
        return 256
    if B >= 256:
        return 128
    if B >= 16:
        return _round_up(pl.cdiv(B, 2), 8)   # two grid steps, 8-aligned
    return 8                            # tiny batch: single step, overhead-bound


def simple_mlp(x, w1, b1, w2, b2, *, tile_b=None):
    """x: (B, D_in) f32; w1: (D_in, H); b1: (H,); w2: (H, C); b2: (C,)."""
    B, D_in = x.shape
    H = w1.shape[1]
    C = w2.shape[1]

    if tile_b is None:
        tile_b = _choose_tile_b(B)
    grid_b = pl.cdiv(B, tile_b)
    B_pad = grid_b * tile_b
    C_pad = _round_up(max(C, 128), 128)   # lane-dense output / clean MXU tile

    # bf16 MXU inputs (f32 accumulation inside the kernel), f32 biases.
    x_b = x.astype(jnp.bfloat16)
    if B_pad != B:
        x_b = jnp.zeros((B_pad, D_in), jnp.bfloat16).at[:B].set(x_b)
    w1_b = w1.astype(jnp.bfloat16)
    w2_b = w2.astype(jnp.bfloat16)
    if C_pad != C:
        w2_b = jnp.zeros((H, C_pad), jnp.bfloat16).at[:, :C].set(w2_b)
    b1_f = b1.reshape(1, H).astype(jnp.float32)
    b2_f = b2.reshape(1, C).astype(jnp.float32)
    if C_pad != C:
        b2_f = jnp.zeros((1, C_pad), jnp.float32).at[:, :C].set(b2_f)

    flops = 2 * B_pad * (D_in * H + H * C_pad)
    bytes_accessed = (x_b.size * 2 + w1_b.size * 2 + w2_b.size * 2
                      + b1_f.size * 4 + b2_f.size * 4 + B_pad * C_pad * 4)

    out = pl.pallas_call(
        mlp_kernel,
        out_shape=jax.ShapeDtypeStruct((B_pad, C_pad), jnp.float32),
        grid_spec=pltpu.PrefetchScalarGridSpec(
            num_scalar_prefetch=0,
            grid=(grid_b,),
            in_specs=[
                pl.BlockSpec((tile_b, D_in), lambda i: (i, 0)),   # x tile
                pl.BlockSpec((D_in, H), lambda i: (0, 0)),        # W1 (resident)
                pl.BlockSpec((1, H), lambda i: (0, 0)),           # b1
                pl.BlockSpec((H, C_pad), lambda i: (0, 0)),       # W2 (resident)
                pl.BlockSpec((1, C_pad), lambda i: (0, 0)),       # b2
            ],
            out_specs=pl.BlockSpec((tile_b, C_pad), lambda i: (i, 0)),
        ),
        compiler_params=pltpu.CompilerParams(
            dimension_semantics=("parallel",)),
        cost_estimate=pl.CostEstimate(
            flops=flops, transcendentals=0, bytes_accessed=bytes_accessed),
    )(x_b, w1_b, b1_f, w2_b, b2_f)

    return out[:B, :C]


def reference_mlp_f32(x, w1, b1, w2, b2):
    h = jnp.maximum(x @ w1 + b1.reshape(1, -1), 0.0)
    return h @ w2 + b2.reshape(1, -1)


def reference_mlp_bf16(x, w1, b1, w2, b2):
    # Same mixed-precision recipe as the kernel (bf16 MXU inputs, f32 acc).
    h = jnp.dot(x.astype(jnp.bfloat16), w1.astype(jnp.bfloat16),
                preferred_element_type=jnp.float32) + b1.reshape(1, -1)
    h = jnp.maximum(h, 0.0)
    return jnp.dot(h.astype(jnp.bfloat16), w2.astype(jnp.bfloat16),
                   preferred_element_type=jnp.float32) + b2.reshape(1, -1)


if __name__ == "__main__":
    input_size = 768
    hidden_size = 256
    num_classes = 10

    key = jax.random.PRNGKey(0)
    kx, kw1, kb1, kw2, kb2, kx2 = jax.random.split(key, 6)

    # Deterministic init (uniform, roughly matching nn.Linear's scale).
    bound1 = 1.0 / (input_size ** 0.5)
    bound2 = 1.0 / (hidden_size ** 0.5)
    w1 = jax.random.uniform(kw1, (input_size, hidden_size), jnp.float32,
                            -bound1, bound1)
    b1 = jax.random.uniform(kb1, (hidden_size,), jnp.float32, -bound1, bound1)
    w2 = jax.random.uniform(kw2, (hidden_size, num_classes), jnp.float32,
                            -bound2, bound2)
    b2 = jax.random.uniform(kb2, (num_classes,), jnp.float32, -bound2, bound2)

    ok = True
    # Case 1: small batch (single grid step).
    x_small = jax.random.normal(kx, (8, input_size), dtype=jnp.float32)
    # Case 2: batch not a multiple of the tile (exercises padding + 2 steps).
    x_big = jax.random.normal(kx2, (200, input_size), dtype=jnp.float32)

    for x in (x_small, x_big):
        out = jax.block_until_ready(simple_mlp(x, w1, b1, w2, b2))
        assert out.shape == (x.shape[0], num_classes)
        ref_mx = reference_mlp_bf16(x, w1, b1, w2, b2)
        ref_f32 = reference_mlp_f32(x, w1, b1, w2, b2)
        ok &= bool(jnp.allclose(out, ref_mx, atol=2e-3, rtol=2e-3))   # same recipe
        ok &= bool(jnp.allclose(out, ref_f32, atol=5e-2, rtol=5e-2))  # bf16 vs f32

    if ok:
        print("KERNEL_OK")
    else:
        print("KERNEL_MISMATCH")
</pallas_src>

<mosaic_0001>
module attributes {stable_mosaic.version = 11 : i64} {
  func.func @mlp_kernel(%arg0: i32, %arg1: memref<8x768xbf16, #tpu.memory_space<vmem>>, %arg2: memref<768x256xbf16, #tpu.memory_space<vmem>>, %arg3: memref<1x256xf32, #tpu.memory_space<vmem>>, %arg4: memref<256x128xbf16, #tpu.memory_space<vmem>>, %arg5: memref<1x128xf32, #tpu.memory_space<vmem>>, %arg6: memref<8x128xf32, #tpu.memory_space<vmem>>) attributes {dimension_semantics = [#tpu.dimension_semantics<parallel>], iteration_bounds = array<i64: 1>, scalar_prefetch = 0 : i64, scratch_operands = 0 : i64, tpu.core_type = #tpu.core_type<tc>, window_params = [{transform_indices = @transform_0, window_bounds = array<i64: 8, 768>}, {pipeline_mode = #tpu.pipeline_mode<synchronous>, transform_indices = @transform_1, window_bounds = array<i64: 768, 256>}, {pipeline_mode = #tpu.pipeline_mode<synchronous>, transform_indices = @transform_2, window_bounds = array<i64: 1, 256>}, {pipeline_mode = #tpu.pipeline_mode<synchronous>, transform_indices = @transform_3, window_bounds = array<i64: 256, 128>}, {pipeline_mode = #tpu.pipeline_mode<synchronous>, transform_indices = @transform_4, window_bounds = array<i64: 1, 128>}, {transform_indices = @transform_5, window_bounds = array<i64: 8, 128>}]} {
    %c0 = arith.constant 0 : index
    %c0_0 = arith.constant 0 : index
    %0 = vector.load %arg1[%c0, %c0_0] : memref<8x768xbf16, #tpu.memory_space<vmem>>, vector<8x768xbf16>
    %c0_1 = arith.constant 0 : index
    %c0_2 = arith.constant 0 : index
    %1 = vector.load %arg2[%c0_1, %c0_2] : memref<768x256xbf16, #tpu.memory_space<vmem>>, vector<768x256xbf16>
    %cst = arith.constant dense<0.000000e+00> : vector<8x256xf32>
    %2 = tpu.matmul %0, %1, %cst {dimension_numbers = #tpu.dot_dimension_numbers<[1], [0], [0], [1], [0, 0, 1, 1], [], []>} : vector<8x768xbf16>, vector<768x256xbf16>, vector<8x256xf32> -> vector<8x256xf32>
    %c0_3 = arith.constant 0 : index
    %c0_4 = arith.constant 0 : index
    %3 = vector.load %arg3[%c0_3, %c0_4] : memref<1x256xf32, #tpu.memory_space<vmem>>, vector<1x256xf32>
    %4 = vector.broadcast %3 : vector<1x256xf32> to vector<8x256xf32>
    %5 = arith.addf %2, %4 : vector<8x256xf32>
    %cst_5 = arith.constant 0.000000e+00 : f32
    %6 = vector.broadcast %cst_5 : f32 to vector<8x256xf32>
    %7 = arith.maximumf %5, %6 : vector<8x256xf32>
    %8 = arith.truncf %7 : vector<8x256xf32> to vector<8x256xbf16>
    %c0_6 = arith.constant 0 : index
    %c0_7 = arith.constant 0 : index
    %9 = vector.load %arg4[%c0_6, %c0_7] : memref<256x128xbf16, #tpu.memory_space<vmem>>, vector<256x128xbf16>
    %cst_8 = arith.constant dense<0.000000e+00> : vector<8x128xf32>
    %10 = tpu.matmul %8, %9, %cst_8 {dimension_numbers = #tpu.dot_dimension_numbers<[1], [0], [0], [1], [0, 0, 1, 1], [], []>} : vector<8x256xbf16>, vector<256x128xbf16>, vector<8x128xf32> -> vector<8x128xf32>
    %c0_9 = arith.constant 0 : index
    %c0_10 = arith.constant 0 : index
    %11 = vector.load %arg5[%c0_9, %c0_10] : memref<1x128xf32, #tpu.memory_space<vmem>>, vector<1x128xf32>
    %12 = vector.broadcast %11 : vector<1x128xf32> to vector<8x128xf32>
    %13 = arith.addf %10, %12 : vector<8x128xf32>
    %c0_11 = arith.constant 0 : index
    %c0_12 = arith.constant 0 : index
    %14 = vector.load %arg6[%c0_11, %c0_12] : memref<8x128xf32, #tpu.memory_space<vmem>>, vector<8x128xf32>
    tpu.vector_store %arg6[%c0_11, %c0_12], %13 {strides = array<i32>} : memref<8x128xf32, #tpu.memory_space<vmem>>, vector<8x128xf32>,
    return
  }
  func.func @transform_0(%arg0: i32) -> (i32, i32) {
    %c0_i32 = arith.constant 0 : i32
    %c0_i32_0 = arith.constant 0 : i32
    return %arg0, %c0_i32 : i32, i32
  }
  func.func @transform_1(%arg0: i32) -> (i32, i32) {
    %c0_i32 = arith.constant 0 : i32
    %c0_i32_0 = arith.constant 0 : i32
    %c0_i32_1 = arith.constant 0 : i32
    return %c0_i32, %c0_i32_0 : i32, i32
  }
  func.func @transform_2(%arg0: i32) -> (i32, i32) {
    %c0_i32 = arith.constant 0 : i32
    %c0_i32_0 = arith.constant 0 : i32
    %c0_i32_1 = arith.constant 0 : i32
    return %c0_i32, %c0_i32_0 : i32, i32
  }
  func.func @transform_3(%arg0: i32) -> (i32, i32) {
    %c0_i32 = arith.constant 0 : i32
    %c0_i32_0 = arith.constant 0 : i32
    %c0_i32_1 = arith.constant 0 : i32
    return %c0_i32, %c0_i32_0 : i32, i32
  }
  func.func @transform_4(%arg0: i32) -> (i32, i32) {
    %c0_i32 = arith.constant 0 : i32
    %c0_i32_0 = arith.constant 0 : i32
    %c0_i32_1 = arith.constant 0 : i32
    return %c0_i32, %c0_i32_0 : i32, i32
  }
  func.func @transform_5(%arg0: i32) -> (i32, i32) {
    %c0_i32 = arith.constant 0 : i32
    %c0_i32_0 = arith.constant 0 : i32
    return %arg0, %c0_i32 : i32, i32
  }
}

</mosaic_0001>

<bundles_post_ra>
// kernel: tpu_custom_call.1
= control target key start
LH: loop header
LB: loop body
LE: loop exit
PB: predicated region body
PF: predicated region fallthrough
CT: control target
= control target key end

     0   :  { %10 = vsyncpa [#allocation3], 0  ;;  %s1513_s0 = inlined_call_operand.hbm [shape: bf16[8,768], index: 0, kind: input, shape index: {}]   ;;  %s1514_s1 = inlined_call_operand.hbm [shape: bf16[768,256], index: 1, kind: input, shape index: {}]   ;;  %s1515_s2 = inlined_call_operand.vmem [shape: f32[1,256], index: 2, kind: input, shape index: {}]   ;;  %s1516_s3 = inlined_call_operand.hbm [shape: bf16[256,128], index: 3, kind: input, shape index: {}]   ;;  %s1517_s4 = inlined_call_operand.vmem [shape: f32[1,128], index: 4, kind: input, shape index: {}]   ;;  %s1518_s5 = inlined_call_operand.hbm [shape: f32[8,128], index: 5, kind: output, shape index: {}]  }
   0x1   :  { %11 = vsyncpa [#allocation6], 0 }
   0x2   :  { %12 = vsyncpa [#allocation4], 0  ;;  %s1409_s18 = smov [#allocation5]   ;;  %s1315_s22 = scalar_lea.hbm %s1514_s1, 12288 }
   0x3   :  { %s28_s19 = sshll.u32 %s1409_s18, 4  ;;  %p1316_p0 = scmp.ne.s32.totalorder %s1514_s1, %s1315_s22  ;;  %s29_s19 = int_to_ptr.vmem [resolvable:$true] %s28_s19 }
   0x4   :  { %p1319_p1 = scmp.lt.u32.totalorder %s1315_s22, %s1514_s1 }
   0x6   :  { %p1321_p2 = pnand %p1319_p1, %p1316_p0 }
   0x8   :  { %1324 = shalt.err (!%p1321_p2)
}
   0x9   :  { %s1325_s27 = scalar_lea.vmem %s29_s19, 12288  ;;  %p1330_p4 = scmp.lt.s32.totalorder %s29_s19, %s29_s19 }
   0xa   :  { %p1326_p3 = scmp.ne.s32.totalorder %s29_s19, %s1325_s27  ;;  %p1331_p5 = scmp.lt.s32.totalorder %s1325_s27, %s1325_s27 }
   0xc   :  { %p1332_p6 = por %p1331_p5, %p1330_p4 }
   0xe   :  { %p1333_p7 = pnand %p1332_p6, %p1326_p3 }
  0x10   :  { %1336 = shalt.err (!%p1333_p7)
}
  0x11   :  { %s1410_s28 = smov 128   ;;  %s1411_s29 = smov 8  }
  0x12   :  { %34 = dma.hbm_to_vmem [thread:$0]  %s1514_s1, 12288, %s29_s19, [#allocation6], %s1410_s28, %s1410_s28, %s1411_s29  }
  0x13   :  { %s1412_s7 = smov [#allocation2]   ;;  %s1413_s9 = smov [#allocation7]  }
  0x14   :  { %s19_s8 = sshll.u32 %s1412_s7, 4  ;;  %s42_s10 = sshll.u32 %s1413_s9, 4  ;;  %s20_s8 = int_to_ptr.vmem [resolvable:$true] %s19_s8  ;;  %s43_s10 = int_to_ptr.vmem [resolvable:$true] %s42_s10 }
  0x15   :  { %s1337_s13 = scalar_lea.hbm %s1513_s0, 384 }
  0x16   :  { %p1338_p8 = scmp.ne.s32.totalorder %s1513_s0, %s1337_s13  ;;  %p1341_p9 = scmp.lt.u32.totalorder %s1337_s13, %s1513_s0 }
  0x18   :  { %p1343_p10 = pnand %p1341_p9, %p1338_p8 }
  0x1a   :  { %1346 = shalt.err (!%p1343_p10)
}
  0x1b   :  { %s1347_s1 = scalar_lea.vmem %s20_s8, 384  ;;  %p1352_p12 = scmp.lt.s32.totalorder %s20_s8, %s20_s8 }
  0x1c   :  { %p1348_p11 = scmp.ne.s32.totalorder %s20_s8, %s1347_s1  ;;  %p1353_p13 = scmp.lt.s32.totalorder %s1347_s1, %s1347_s1 }
  0x1e   :  { %p1354_p0 = por %p1353_p13, %p1352_p12 }
  0x20   :  { %p1355_p1 = pnand %p1354_p0, %p1348_p11 }
  0x22   :  { %1358 = shalt.err (!%p1355_p1)
}
  0x23   :  { %22 = dma.hbm_to_vmem [thread:$0]  %s1513_s0, 384, %s20_s8, [#allocation3]  }
  0x24   :  { %s1359_s22 = scalar_lea.hbm %s1516_s3, 2048 }
  0x25   :  { %p1360_p2 = scmp.ne.s32.totalorder %s1516_s3, %s1359_s22  ;;  %p1363_p3 = scmp.lt.u32.totalorder %s1359_s22, %s1516_s3 }
  0x27   :  { %p1365_p4 = pnand %p1363_p3, %p1360_p2 }
  0x29   :  { %1368 = shalt.err (!%p1365_p4)
}
  0x2a   :  { %s1369_s27 = scalar_lea.vmem %s43_s10, 2048  ;;  %p1374_p6 = scmp.lt.s32.totalorder %s43_s10, %s43_s10 }
  0x2b   :  { %p1370_p5 = scmp.ne.s32.totalorder %s43_s10, %s1369_s27  ;;  %p1375_p7 = scmp.lt.s32.totalorder %s1369_s27, %s1369_s27 }
  0x2d   :  { %p1376_p8 = por %p1375_p7, %p1374_p6 }
  0x2f   :  { %p1377_p9 = pnand %p1376_p8, %p1370_p5 }
  0x31   :  { %1380 = shalt.err (!%p1377_p9)
}
  0x32   :  { %s1414_s0 = smov 64   ;;  %s1415_s28 = smov 4  }
  0x33   :  { %48 = dma.hbm_to_vmem [thread:$0]  %s1516_s3, 2048, %s43_s10, [#allocation6], %s1414_s0, %s1414_s0, %s1415_s28  }
  0x34   :  { %1403 = dma.done.wait [#allocation3], 384  }
  0x35   :  { %1404 = vsyncadd [#allocation3], 4294966912 }
  0x36   :  { %1405 = dma.done.wait [#allocation6], 14336  }
  0x37   :  { %1406 = vsyncadd [#allocation6], 4294952960  ;;  %v1149_v0 = vld [vmem:[#allocation5 + $0x104] ss:$8 sps:$4 sm:$0xff]   ;;  %v1151_v1 = vld [vmem:[#allocation5 + $0x100] ss:$8 sps:$4 sm:$0xff]  }
  0x38   :  { %714 = vmatprep.subr.bf16.mxu0 %v1149_v0  ;;  %v1152_v2 = vld [vmem:[#allocation5 + $0x114] ss:$8 sps:$4 sm:$0xff]   ;;  %v1154_v3 = vld [vmem:[#allocation5 + $0x110] ss:$8 sps:$4 sm:$0xff]   ;;  %v1155_v4 = vld [vmem:[#allocation5 + $0x124] ss:$8 sps:$4 sm:$0xff]  }
  0x39   :  { %715 = vmatpush1.bf16.msra.mxu0 %v1151_v1  ;;  %v1157_v5 = vld [vmem:[#allocation5 + $0x120] ss:$8 sps:$4 sm:$0xff]   ;;  %v1158_v6 = vld [vmem:[#allocation5 + $0x134] ss:$8 sps:$4 sm:$0xff]   ;;  %v1160_v7 = vld [vmem:[#allocation5 + $0x130] ss:$8 sps:$4 sm:$0xff]  }
  0x3a   :  { %716 = vmatprep.subr.bf16.mxu0 %v1152_v2  ;;  %v1161_v8 = vld [vmem:[#allocation5 + $0x144] ss:$8 sps:$4 sm:$0xff]   ;;  %v1163_v9 = vld [vmem:[#allocation5 + $0x140] ss:$8 sps:$4 sm:$0xff]   ;;  %v1164_v10 = vld [vmem:[#allocation5 + $0x154] ss:$8 sps:$4 sm:$0xff]  }
  0x3b   :  { %v1166_v11 = vld [vmem:[#allocation5 + $0x150] ss:$8 sps:$4 sm:$0xff]   ;;  %v1167_v12 = vld [vmem:[#allocation5 + $0x164] ss:$8 sps:$4 sm:$0xff]   ;;  %v1196_v14 = vld [vmem:[#allocation5] ss:$8 sps:$4 sm:$0xff]  }
  0x3c   :  { %v1194_v13 = vld [vmem:[#allocation5 + $0x4] ss:$8 sps:$4 sm:$0xff]   ;;  %v1169_v15 = vld [vmem:[#allocation5 + $0x160] ss:$8 sps:$4 sm:$0xff]   ;;  %v1170_v16 = vld [vmem:[#allocation5 + $0x174] ss:$8 sps:$4 sm:$0xff]  }
  0x3d   :  { %717 = vmatpush1.bf16.msra.mxu0 %v1154_v3  ;;  %673 = vmatprep.subr.bf16.mxu1 %v1194_v13  ;;  %v1200_v17 = vld [vmem:[#allocation5 + $0x14] ss:$8 sps:$4 sm:$0xff]   ;;  %v1202_v18 = vld [vmem:[#allocation5 + $0x10] ss:$8 sps:$4 sm:$0xff]   ;;  %v1208_v22 = vld [vmem:[#allocation5 + $0x24] ss:$8 sps:$4 sm:$0xff]  }
  0x3e   :  { %718 = vmatprep.subr.bf16.mxu0 %v1155_v4  ;;  %674 = vmatpush1.bf16.msra.mxu1 %v1196_v14  ;;  %v1483_v19 = vld [vmem:[#allocation2 + $0x8] sm:$0xff]  ;;  %v1210_v23 = vld [vmem:[#allocation5 + $0x20] ss:$8 sps:$4 sm:$0xff]   ;;  %v1173_v24 = vld [vmem:[#allocation5 + $0x184] ss:$8 sps:$4 sm:$0xff]   ;;  %s1416_s8 = smov [#allocation8]  }
  0x3f   :  { %675 = vmatprep.subr.bf16.mxu1 %v1200_v17  ;;  %v995_v20 = vcombine.high %v1483_v19, %v1483_v19  ;;  %v1172_v21 = vld [vmem:[#allocation5 + $0x170] ss:$8 sps:$4 sm:$0xff]   ;;  %v1214_v25 = vld [vmem:[#allocation5 + $0x34] ss:$8 sps:$4 sm:$0xff]   ;;  %v1175_v26 = vld [vmem:[#allocation5 + $0x180] ss:$8 sps:$4 sm:$0xff]   ;;  %v994_v58 = vcombine.low %v1483_v19, %v1483_v19 }
  0x40   :  { %v1176_v27 = vld [vmem:[#allocation5 + $0x194] ss:$8 sps:$4 sm:$0xff]   ;;  %v1216_v28 = vld [vmem:[#allocation5 + $0x30] ss:$8 sps:$4 sm:$0xff]   ;;  %v1220_v29 = vld [vmem:[#allocation5 + $0x44] ss:$8 sps:$4 sm:$0xff]  }
  0x41   :  { %719 = vmatpush1.bf16.msra.mxu0 %v1157_v5  ;;  %746 = vmatprep.mubr.bf16.mxu0 %v995_v20  ;;  %v1178_v30 = vld [vmem:[#allocation5 + $0x190] ss:$8 sps:$4 sm:$0xff]   ;;  %v1179_v31 = vld [vmem:[#allocation5 + $0x1a4] ss:$8 sps:$4 sm:$0xff]   ;;  %v1222_v32 = vld [vmem:[#allocation5 + $0x40] ss:$8 sps:$4 sm:$0xff]  }
  0x42   :  { %720 = vmatprep.subr.bf16.mxu0 %v1158_v6  ;;  %676 = vmatpush1.bf16.msra.mxu1 %v1202_v18  ;;  %v1226_v33 = vld [vmem:[#allocation5 + $0x54] ss:$8 sps:$4 sm:$0xff]   ;;  %v1181_v34 = vld [vmem:[#allocation5 + $0x1a0] ss:$8 sps:$4 sm:$0xff]   ;;  %v1228_v36 = vld [vmem:[#allocation5 + $0x50] ss:$8 sps:$4 sm:$0xff]  }
  0x43   :  { %677 = vmatprep.subr.bf16.mxu1 %v1208_v22  ;;  %v1182_v35 = vld [vmem:[#allocation5 + $0x1b4] ss:$8 sps:$4 sm:$0xff]   ;;  %v1232_v37 = vld [vmem:[#allocation5 + $0x64] ss:$8 sps:$4 sm:$0xff]   ;;  %v1184_v38 = vld [vmem:[#allocation5 + $0x1b0] ss:$8 sps:$4 sm:$0xff]  }
  0x44   :  { %v1185_v39 = vld [vmem:[#allocation5 + $0x1c4] ss:$8 sps:$4 sm:$0xff]   ;;  %v1234_v40 = vld [vmem:[#allocation5 + $0x60] ss:$8 sps:$4 sm:$0xff]   ;;  %v1238_v41 = vld [vmem:[#allocation5 + $0x74] ss:$8 sps:$4 sm:$0xff]  }
  0x45   :  { %721 = vmatpush1.bf16.msra.mxu0 %v1160_v7  ;;  %v1187_v42 = vld [vmem:[#allocation5 + $0x1c0] ss:$8 sps:$4 sm:$0xff]   ;;  %v1188_v43 = vld [vmem:[#allocation5 + $0x1d4] ss:$8 sps:$4 sm:$0xff]   ;;  %v1240_v44 = vld [vmem:[#allocation5 + $0x70] ss:$8 sps:$4 sm:$0xff]  }
  0x46   :  { %722 = vmatprep.subr.bf16.mxu0 %v1161_v8  ;;  %678 = vmatpush1.bf16.msra.mxu1 %v1210_v23  ;;  %v1244_v45 = vld [vmem:[#allocation5 + $0x84] ss:$8 sps:$4 sm:$0xff]   ;;  %v1190_v46 = vld [vmem:[#allocation5 + $0x1d0] ss:$8 sps:$4 sm:$0xff]   ;;  %v1246_v48 = vld [vmem:[#allocation5 + $0x80] ss:$8 sps:$4 sm:$0xff]  }
  0x47   :  { %679 = vmatprep.subr.bf16.mxu1 %v1214_v25  ;;  %v1191_v47 = vld [vmem:[#allocation5 + $0x1e4] ss:$8 sps:$4 sm:$0xff]   ;;  %v1250_v49 = vld [vmem:[#allocation5 + $0x94] ss:$8 sps:$4 sm:$0xff]   ;;  %v1193_v50 = vld [vmem:[#allocation5 + $0x1e0] ss:$8 sps:$4 sm:$0xff]  }
  0x48   :  { %v1197_v51 = vld [vmem:[#allocation5 + $0x1f4] ss:$8 sps:$4 sm:$0xff]   ;;  %v1252_v52 = vld [vmem:[#allocation5 + $0x90] ss:$8 sps:$4 sm:$0xff]   ;;  %v1256_v53 = vld [vmem:[#allocation5 + $0xa4] ss:$8 sps:$4 sm:$0xff]  }
  0x49   :  { %723 = vmatpush1.bf16.msra.mxu0 %v1163_v9  ;;  %v1199_v54 = vld [vmem:[#allocation5 + $0x1f0] ss:$8 sps:$4 sm:$0xff]   ;;  %v1207_v55 = vld [vmem:[#allocation5 + $0x204] ss:$8 sps:$4 sm:$0xff]   ;;  %v1258_v56 = vld [vmem:[#allocation5 + $0xa0] ss:$8 sps:$4 sm:$0xff]  }
  0x4a   :  { %724 = vmatprep.subr.bf16.mxu0 %v1164_v10  ;;  %680 = vmatpush1.bf16.msra.mxu1 %v1216_v28  ;;  %v1262_v57 = vld [vmem:[#allocation5 + $0xb4] ss:$8 sps:$4 sm:$0xff]   ;;  %v1205_v59 = vld [vmem:[#allocation5 + $0x200] ss:$8 sps:$4 sm:$0xff]   ;;  %v1264_v60 = vld [vmem:[#allocation5 + $0xb0] ss:$8 sps:$4 sm:$0xff]  }
  0x4b   :  { %681 = vmatprep.subr.bf16.mxu1 %v1220_v29  ;;  %v61_v61 = vld [vmem:[#allocation2] sm:$0xff]  ;;  %v1213_v62 = vld [vmem:[#allocation5 + $0x214] ss:$8 sps:$4 sm:$0xff]   ;;  %v1211_v2 = vld [vmem:[#allocation5 + $0x210] ss:$8 sps:$4 sm:$0xff]   ;;  %s982_s9 = sshll.u32 %s1416_s8, 4  ;;  %s983_s9 = int_to_ptr.vmem [resolvable:$true] %s982_s9 }
  0x4c   :  { %v1268_v63 = vld [vmem:[#allocation5 + $0xc4] ss:$8 sps:$4 sm:$0xff]   ;;  %v993_v0 = vcombine.high %v61_v61, %v61_v61  ;;  %v1489_v1 = vld [vmem:[#allocation2 + $0x10] sm:$0xff]  ;;  %v1270_v5 = vld [vmem:[#allocation5 + $0xc0] ss:$8 sps:$4 sm:$0xff]   ;;  %v992_v19 = vcombine.low %v61_v61, %v61_v61  ;;  %v162_v61 = vlaneseq  ;;  %s1381_s10 = scalar_lea.vmem %s983_s9, 128  ;;  %p1386_p11 = scmp.lt.s32.totalorder %s983_s9, %s983_s9 }
  0x4d   :  { %725 = vmatpush1.bf16.msra.mxu0 %v1166_v11  ;;  %v997_v3 = vcombine.high %v1489_v1, %v1489_v1  ;;  %v1219_v4 = vld [vmem:[#allocation5 + $0x224] ss:$8 sps:$4 sm:$0xff]   ;;  %v1274_v6 = vld [vmem:[#allocation5 + $0xd4] ss:$8 sps:$4 sm:$0xff]   ;;  %v1217_v7 = vld [vmem:[#allocation5 + $0x220] ss:$8 sps:$4 sm:$0xff]   ;;  %p1382_p10 = scmp.ne.s32.totalorder %s983_s9, %s1381_s10  ;;  %p1387_p12 = scmp.lt.s32.totalorder %s1381_s10, %s1381_s10 }
  0x4e   :  { %726 = vmatprep.subr.bf16.mxu0 %v1167_v12  ;;  %682 = vmatpush1.bf16.msra.mxu1 %v1222_v32  ;;  %v1225_v8 = vld [vmem:[#allocation5 + $0x234] ss:$8 sps:$4 sm:$0xff]   ;;  %v1276_v9 = vld [vmem:[#allocation5 + $0xd0] ss:$8 sps:$4 sm:$0xff]   ;;  %v1280_v10 = vld [vmem:[#allocation5 + $0xe4] ss:$8 sps:$4 sm:$0xff]  }
  0x4f   :  { %683 = vmatprep.subr.bf16.mxu1 %v1226_v33  ;;  %705 = vmatprep.mubr.bf16.mxu1 %v993_v0  ;;  %v1223_v11 = vld [vmem:[#allocation5 + $0x230] ss:$8 sps:$4 sm:$0xff]   ;;  %v1231_v12 = vld [vmem:[#allocation5 + $0x244] ss:$8 sps:$4 sm:$0xff]   ;;  %v1282_v13 = vld [vmem:[#allocation5 + $0xe0] ss:$8 sps:$4 sm:$0xff]   ;;  %p1388_p13 = por %p1387_p12, %p1386_p11 }
  0x50   :  { %v1286_v14 = vld [vmem:[#allocation5 + $0xf4] ss:$8 sps:$4 sm:$0xff]   ;;  %v1299_v18 = vld [vmem:[#allocation7 + $0x40] sm:$0xff]   ;;  %v1235_v20 = vld [vmem:[#allocation5 + $0x250] ss:$8 sps:$4 sm:$0xff]  }
  0x51   :  { %727 = vmatpush1.bf16.msra.mxu0 %v1169_v15  ;;  %v1229_v15 = vld [vmem:[#allocation5 + $0x240] ss:$8 sps:$4 sm:$0xff]   ;;  %v1237_v17 = vld [vmem:[#allocation5 + $0x254] ss:$8 sps:$4 sm:$0xff]   ;;  %v1243_v22 = vld [vmem:[#allocation5 + $0x264] ss:$8 sps:$4 sm:$0xff]   ;;  %p1389_p0 = pnand %p1388_p13, %p1382_p10 }
  0x52   :  { %728 = vmatprep.subr.bf16.mxu0 %v1170_v16  ;;  %684 = vmatpush1.bf16.msra.mxu1 %v1228_v36  ;;  %v1288_v16 = vld [vmem:[#allocation5 + $0xf0] ss:$8 sps:$4 sm:$0xff]   ;;  %v1301_v23 = vld [vmem:[#allocation7 + $0x48] sm:$0xff]  }
  0x53   :  { %685 = vmatprep.subr.bf16.mxu1 %v1232_v37  ;;  %v1302_v25 = vld [vmem:[#allocation7 + $0x8] sm:$0xff]   ;;  %v1247_v28 = vld [vmem:[#allocation5 + $0x270] ss:$8 sps:$4 sm:$0xff]   ;;  %v1308_v37 = vld [vmem:[#allocation7 + $0x20] sm:$0xff]  }
  0x54   :  { %v1304_v29 = vld [vmem:[#allocation7 + $0x10] sm:$0xff]   ;;  %v1253_v32 = vld [vmem:[#allocation5 + $0x280] ss:$8 sps:$4 sm:$0xff]   ;;  %v1306_v33 = vld [vmem:[#allocation7 + $0x18] sm:$0xff]  }
  0x55   :  { %729 = vmatpush1.bf16.msra.mxu0 %v1172_v21  ;;  %v1300_v21 = vld [vmem:[#allocation7] sm:$0xff]   ;;  %v1259_v36 = vld [vmem:[#allocation5 + $0x290] ss:$8 sps:$4 sm:$0xff]   ;;  %v160_v0 = vld [vmem:[%s1515_s2] sm:$0x3] }
  0x56   :  { %730 = vmatprep.subr.bf16.mxu0 %v1173_v24  ;;  %686 = vmatpush1.bf16.msra.mxu1 %v1234_v40  ;;  %v1241_v24 = vld [vmem:[#allocation5 + $0x260] ss:$8 sps:$4 sm:$0xff]   ;;  %v1273_v40 = vld [vmem:[#allocation5 + $0x2b4] ss:$8 sps:$4 sm:$0xff]  }
  0x57   :  { %687 = vmatprep.subr.bf16.mxu1 %v1238_v41  ;;  %v1271_v41 = vld [vmem:[#allocation5 + $0x2b0] ss:$8 sps:$4 sm:$0xff]  }
  0x59   :  { %731 = vmatpush1.bf16.msra.mxu0 %v1175_v26  ;;  %v1249_v26 = vld [vmem:[#allocation5 + $0x274] ss:$8 sps:$4 sm:$0xff]  }
  0x5a   :  { %732 = vmatprep.subr.bf16.mxu0 %v1176_v27  ;;  %688 = vmatpush1.bf16.msra.mxu1 %v1240_v44  ;;  %v1303_v27 = vld [vmem:[#allocation7 + $0x50] sm:$0xff]  }
  0x5b   :  { %689 = vmatprep.subr.bf16.mxu1 %v1244_v45  ;;  %v1285_v44 = vld [vmem:[#allocation5 + $0x2d4] ss:$8 sps:$4 sm:$0xff]   ;;  %v1283_v45 = vld [vmem:[#allocation5 + $0x2d0] ss:$8 sps:$4 sm:$0xff]  }
  0x5d   :  { %733 = vmatpush1.bf16.msra.mxu0 %v1178_v30  ;;  %v1255_v30 = vld [vmem:[#allocation5 + $0x284] ss:$8 sps:$4 sm:$0xff]  }
  0x5e   :  { %734 = vmatprep.subr.bf16.mxu0 %v1179_v31  ;;  %690 = vmatpush1.bf16.msra.mxu1 %v1246_v48  ;;  %v1305_v31 = vld [vmem:[#allocation7 + $0x58] sm:$0xff]  }
  0x5f   :  { %691 = vmatprep.subr.bf16.mxu1 %v1250_v49  ;;  %v1296_v48 = vld [vmem:[#allocation5 + $0x2f4] ss:$8 sps:$4 sm:$0xff]   ;;  %v1294_v49 = vld [vmem:[#allocation5 + $0x2f0] ss:$8 sps:$4 sm:$0xff]  }
  0x61   :  { %735 = vmatpush1.bf16.msra.mxu0 %v1181_v34  ;;  %v1261_v34 = vld [vmem:[#allocation5 + $0x294] ss:$8 sps:$4 sm:$0xff]  }
  0x62   :  { %736 = vmatprep.subr.bf16.mxu0 %v1182_v35  ;;  %692 = vmatpush1.bf16.msra.mxu1 %v1252_v52  ;;  %v1307_v35 = vld [vmem:[#allocation7 + $0x60] sm:$0xff]   ;;  %v1310_v52 = vld [vmem:[#allocation7 + $0x28] sm:$0xff]  }
  0x63   :  { %693 = vmatprep.subr.bf16.mxu1 %v1256_v53  ;;  %v1311_v53 = vld [vmem:[#allocation7 + $0x70] sm:$0xff]  }
  0x65   :  { %737 = vmatpush1.bf16.msra.mxu0 %v1184_v38  ;;  %v1267_v38 = vld [vmem:[#allocation5 + $0x2a4] ss:$8 sps:$4 sm:$0xff]  }
  0x66   :  { %738 = vmatprep.subr.bf16.mxu0 %v1185_v39  ;;  %694 = vmatpush1.bf16.msra.mxu1 %v1258_v56  ;;  %v1265_v39 = vld [vmem:[#allocation5 + $0x2a0] ss:$8 sps:$4 sm:$0xff]   ;;  %v1314_v56 = vld [vmem:[#allocation7 + $0x38] sm:$0xff]  }
  0x67   :  { %695 = vmatprep.subr.bf16.mxu1 %v1262_v57 }
  0x69   :  { %739 = vmatpush1.bf16.msra.mxu0 %v1187_v42  ;;  %v1279_v42 = vld [vmem:[#allocation5 + $0x2c4] ss:$8 sps:$4 sm:$0xff]  }
  0x6a   :  { %740 = vmatprep.subr.bf16.mxu0 %v1188_v43  ;;  %696 = vmatpush1.bf16.msra.mxu1 %v1264_v60  ;;  %v1277_v43 = vld [vmem:[#allocation5 + $0x2c0] ss:$8 sps:$4 sm:$0xff]  }
  0x6b   :  { %697 = vmatprep.subr.bf16.mxu1 %v1268_v63 }
  0x6d   :  { %741 = vmatpush1.bf16.msra.mxu0 %v1190_v46  ;;  %v1291_v46 = vld [vmem:[#allocation5 + $0x2e4] ss:$8 sps:$4 sm:$0xff]  }
  0x6e   :  { %742 = vmatprep.subr.bf16.mxu0 %v1191_v47  ;;  %698 = vmatpush1.bf16.msra.mxu1 %v1270_v5  ;;  %v1289_v47 = vld [vmem:[#allocation5 + $0x2e0] ss:$8 sps:$4 sm:$0xff]  }
  0x6f   :  { %699 = vmatprep.subr.bf16.mxu1 %v1274_v6 }
  0x71   :  { %743 = vmatpush1.bf16.msra.mxu0 %v1193_v50  ;;  %v996_v50 = vcombine.low %v1489_v1, %v1489_v1 }
  0x72   :  { %744 = vmatprep.subr.bf16.mxu0 %v1197_v51  ;;  %700 = vmatpush1.bf16.msra.mxu1 %v1276_v9  ;;  %v1309_v51 = vld [vmem:[#allocation7 + $0x68] sm:$0xff]  }
  0x73   :  { %701 = vmatprep.subr.bf16.mxu1 %v1280_v10 }
  0x75   :  { %745 = vmatpush1.bf16.msra.mxu0 %v1199_v54  ;;  %v1312_v54 = vld [vmem:[#allocation7 + $0x30] sm:$0xff]  }
  0x76   :  { %755 = vmatprep.subr.bf16.mxu0 %v1207_v55  ;;  %702 = vmatpush1.bf16.msra.mxu1 %v1282_v13  ;;  %v1313_v55 = vld [vmem:[#allocation7 + $0x78] sm:$0xff]  }
  0x77   :  { %703 = vmatprep.subr.bf16.mxu1 %v1286_v14 }
  0x78   :  { %747 = vmatmul.mubr.bf16.vlgmr.msra.gmra.mrb[0].mxu0 %v994_v58 }
  0x79   :  { %756 = vmatpush1.bf16.msra.mxu0 %v1205_v59  ;;  %787 = vmatprep.mubr.bf16.mxu0 %v997_v3 }
  0x7a   :  { %757 = vmatprep.subr.bf16.mxu0 %v1213_v62  ;;  %704 = vmatpush1.bf16.msra.mxu1 %v1288_v16  ;;  %v163_v62 = vshrl.u32 %v162_v61, 7 }
  0x7b   :  { %1111 = vmatprep.subr.bf16.mxu1 %v1299_v18 }
  0x7c   :  { %v164_v63 = vsub.s32 0, %v163_v62  ;;  %v168_v1 = vsub.s32 1, %v163_v62 }
  0x7d   :  { %758 = vmatpush1.bf16.msra.mxu0 %v1211_v2  ;;  %706 = vmatmul.mubr.bf16.vlgmr.msra.gmra.mrb[0].mxu1 %v992_v19 }
  0x7e   :  { %759 = vmatprep.subr.bf16.mxu0 %v1219_v4  ;;  %1112 = vmatpush3.bf16.msra.mxu1 %v1300_v21  ;;  %v165_v2 = vrot.slane %v160_v0, %v164_v63  ;;  %v169_v3 = vrot.slane %v160_v0, %v168_v1 }
  0x7f   :  { %1113 = vmatprep.subr.bf16.mxu1 %v1301_v23 }
  0x81   :  { %760 = vmatpush1.bf16.msra.mxu0 %v1217_v7 }
  0x82   :  { %761 = vmatprep.subr.bf16.mxu0 %v1225_v8  ;;  %1114 = vmatpush3.bf16.msra.mxu1 %v1302_v25 }
  0x83   :  { %1115 = vmatprep.subr.bf16.mxu1 %v1303_v27 }
  0x85   :  { %762 = vmatpush1.bf16.msra.mxu0 %v1223_v11 }
  0x86   :  { %763 = vmatprep.subr.bf16.mxu0 %v1231_v12  ;;  %1116 = vmatpush3.bf16.msra.mxu1 %v1304_v29 }
  0x87   :  { %1117 = vmatprep.subr.bf16.mxu1 %v1305_v31 }
  0x89   :  { %764 = vmatpush1.bf16.msra.mxu0 %v1229_v15 }
  0x8a   :  { %765 = vmatprep.subr.bf16.mxu0 %v1237_v17  ;;  %1118 = vmatpush3.bf16.msra.mxu1 %v1306_v33  ;;  %v1094_v17 = vld [vmem:[%s1517_s4] ss:$0 sm:$0xff] }
  0x8b   :  { %1119 = vmatprep.subr.bf16.mxu1 %v1307_v35 }
  0x8d   :  { %766 = vmatpush1.bf16.msra.mxu0 %v1235_v20 }
  0x8e   :  { %767 = vmatprep.subr.bf16.mxu0 %v1243_v22  ;;  %1120 = vmatpush3.bf16.msra.mxu1 %v1308_v37 }
  0x8f   :  { %1121 = vmatprep.subr.bf16.mxu1 %v1309_v51 }
  0x91   :  { %768 = vmatpush1.bf16.msra.mxu0 %v1241_v24 }
  0x92   :  { %769 = vmatprep.subr.bf16.mxu0 %v1249_v26  ;;  %1122 = vmatpush3.bf16.msra.mxu1 %v1310_v52 }
  0x93   :  { %1123 = vmatprep.subr.bf16.mxu1 %v1311_v53 }
  0x95   :  { %770 = vmatpush1.bf16.msra.mxu0 %v1247_v28 }
  0x96   :  { %771 = vmatprep.subr.bf16.mxu0 %v1255_v30  ;;  %1124 = vmatpush3.bf16.msra.mxu1 %v1312_v54 }
  0x97   :  { %1125 = vmatprep.subr.bf16.mxu1 %v1313_v55 }
  0x99   :  { %772 = vmatpush1.bf16.msra.mxu0 %v1253_v32 }
  0x9a   :  { %773 = vmatprep.subr.bf16.mxu0 %v1261_v34  ;;  %1126 = vmatpush3.bf16.msra.mxu1 %v1314_v56 }
  0x9d   :  { %774 = vmatpush1.bf16.msra.mxu0 %v1259_v36 }
  0x9e   :  { %775 = vmatprep.subr.bf16.mxu0 %v1267_v38 }
  0xa1   :  { %776 = vmatpush1.bf16.msra.mxu0 %v1265_v39 }
  0xa2   :  { %777 = vmatprep.subr.bf16.mxu0 %v1273_v40 }
  0xa5   :  { %778 = vmatpush1.bf16.msra.mxu0 %v1271_v41 }
  0xa6   :  { %779 = vmatprep.subr.bf16.mxu0 %v1279_v42 }
  0xa9   :  { %780 = vmatpush1.bf16.msra.mxu0 %v1277_v43 }
  0xaa   :  { %781 = vmatprep.subr.bf16.mxu0 %v1285_v44 }
  0xad   :  { %782 = vmatpush1.bf16.msra.mxu0 %v1283_v45 }
  0xae   :  { %783 = vmatprep.subr.bf16.mxu0 %v1291_v46 }
  0xb1   :  { %784 = vmatpush1.bf16.msra.mxu0 %v1289_v47 }
  0xb2   :  { %785 = vmatprep.subr.bf16.mxu0 %v1296_v48 }
  0xb5   :  { %786 = vmatpush1.bf16.msra.mxu0 %v1294_v49 }
  0xb8   :  { %788 = vmatmul.mubr.bf16.vlgmr.msra.gmra.mrb[0].mxu0 %v996_v50 }
 0x150   :  { %v707_v57 = vpop.f32.mrb[0].mxu1 }
 0x151   :  { %v709_v58 = vpop.f32.mrb[1].mxu1  ;;  %v708_v4 = vadd.f32 %v707_v57, %v165_v2 }
 0x152   :  { %v711_v59 = vpop.f32.mrb[2].mxu1  ;;  %v710_v5 = vadd.f32 %v709_v58, %v169_v3 }
 0x153   :  { %v712_v60 = vpop.f32.mrb[3].mxu1 }
 0x18b   :  { %v789_v6 = vpop.f32.mrb[0].mxu0 }
 0x18c   :  { %v1134_v7 = vadd.f32 %v789_v6, %v708_v4  ;;  %v791_v8 = vpop.f32.mrb[1].mxu0 }
 0x18d   :  { %v1136_v9 = vadd.f32 %v791_v8, %v710_v5  ;;  %v793_v10 = vpop.f32.mrb[2].mxu0 }
 0x18e   :  { %v796_v11 = vmax.f32 %v1134_v7, 0.0  ;;  %v794_v12 = vpop.f32.mrb[3].mxu0 }
 0x18f   :  { %v797_v13 = vmax.f32 %v1136_v9, 0.0 }
 0x190   :  { %v798_v15 = vpack.c.bf16 %v796_v11, %v796_v11 }
 0x191   :  { %v799_v14 = vpack.c.bf16 %v797_v13, %v797_v13 }
 0x193   :  { %967 = vmatprep.mubr.bf16.mxu1 %v799_v14 }
 0x194   :  { %968 = vmatmul.mubr.bf16.vlgmr.msra.gmra.mrb[4].mxu1 %v798_v15 }
 0x267   :  { %v1127_v16 = vpop.f32.mrb[4].mxu1 }
 0x268   :  { %v1128_v18 = vpop.f32.mrb[5].mxu1 }
 0x269   :  { %v1129_v19 = vadd.f32 %v1128_v18, %v1127_v16  ;;  %v1130_v20 = vpop.f32.mrb[6].mxu1 }
 0x26a   :  { %v1131_v21 = vpop.f32.mrb[7].mxu1 }
 0x26b   :  { %v970_v22 = vadd.f32 %v1129_v19, %v1094_v17 }
 0x26d   :  { %975 = vst [vmem:[#allocation8] sm:$0xff] %v970_v22 }
 0x26e   :  { %1392 = shalt.err (!%p1389_p0)
}
 0x26f   :  { %s1393_s4 = scalar_lea.hbm %s1518_s5, 128 }
 0x270   :  { %p1394_p1 = scmp.ne.s32.totalorder %s1518_s5, %s1393_s4  ;;  %p1397_p2 = scmp.lt.u32.totalorder %s1393_s4, %s1518_s5 }
 0x272   :  { %p1399_p3 = pnand %p1397_p2, %p1394_p1 }
 0x274   :  { %1402 = shalt.err (!%p1399_p3)
}
 0x275   :  { %985 = dma.vmem_to_hbm [thread:$0]  %s983_s9, 128, %s1518_s5, [#allocation4]  }
 0x276   :  { %1407 = dma.done.wait [#allocation4], 128  }
 0x277   :  { %1408 = vsyncadd [#allocation4], 4294967168 }
 0x278   :  { %989 = vsyncpa [#allocation3], 1 }
 0x279   :  { %990 = vsyncpa [#allocation6], 1 }
 0x27a   :  { %991 = vsyncpa [#allocation4], 1 }

</bundles_post_ra>
